<compile_context>
chip_gen: v5e
topology: v5e:2x2
jax: 0.10.0
libtpu: 0.0.40
codegen_flags: <defaults>
</compile_context>

<pallas_src>
import jax
import jax.numpy as jnp
from jax.experimental import pallas as pl
from jax.experimental.pallas import tpu as pltpu


def gate_multi_kernel(x_ent_ref, x_num_ref, x_txt_ref,
                      w_ent_ref, w_num_ref, w_txt_ref, b_ref,
                      out_ref):
    """Fused forward for one batch tile.

    w_*_ref: (K_mod, 2E) where columns [0:E] feed tanh (g head) and columns
    [E:2E] feed sigmoid (gate head). b_ref: (1, 2E) fused bias.
    """
    x_ent = x_ent_ref[...]
    x_num = x_num_ref[...]
    x_txt = x_txt_ref[...]

    E = out_ref.shape[-1]

    # Fused (tb, 2E) accumulator, initialized with the fused bias, then one
    # matmul per modality (3 MXU pushes instead of 6; f32 accumulation).
    acc = b_ref[...].astype(jnp.float32)
    acc = acc + jnp.dot(x_ent, w_ent_ref[...], preferred_element_type=jnp.float32)
    acc = acc + jnp.dot(x_num, w_num_ref[...], preferred_element_type=jnp.float32)
    acc = acc + jnp.dot(x_txt, w_txt_ref[...], preferred_element_type=jnp.float32)

    g_embedded = jnp.tanh(acc[:, :E])          # g head
    gate = jax.nn.sigmoid(acc[:, E:])          # gate head

    x_ent_f32 = x_ent.astype(jnp.float32)
    out = (1.0 - gate) * x_ent_f32 + gate * g_embedded
    # TODO(synk): for production E < 128, store into a lane-dense
    # (tb*E//128, 128) slab to avoid masked vst; skipped here since the
    # in-kernel cross-lane relayout isn't worth it at these tiny shapes.
    out_ref[...] = out.astype(out_ref.dtype)


def prepare_gate_multi_params(params, weight_dtype=None):
    """One-time parameter prep (hoisted out of the forward pass).

    params uses PyTorch nn.Linear layout:
      g_w: (E, E+Nn+Nt), g_b: (E,),
      gate_ent_w: (E, E), gate_num_w: (E, Nn), gate_txt_w: (E, Nt),
      gate_bias: (E,)
    Returns fused, pre-transposed operands:
      w_ent: (E, 2E), w_num: (Nn, 2E), w_txt: (Nt, 2E), b: (1, 2E)
    """
    E = params["gate_ent_w"].shape[0]
    Nn = params["gate_num_w"].shape[1]
    Nt = params["gate_txt_w"].shape[1]
    assert params["g_w"].shape == (E, E + Nn + Nt)

    g_wT = params["g_w"].T                                            # (E+Nn+Nt, E)
    w_ent = jnp.concatenate([g_wT[:E], params["gate_ent_w"].T], axis=1)          # (E,  2E)
    w_num = jnp.concatenate([g_wT[E:E + Nn], params["gate_num_w"].T], axis=1)    # (Nn, 2E)
    w_txt = jnp.concatenate([g_wT[E + Nn:], params["gate_txt_w"].T], axis=1)     # (Nt, 2E)
    b = jnp.concatenate([params["g_b"], params["gate_bias"]]).reshape(1, 2 * E)  # (1,  2E)

    if weight_dtype is not None:
        w_ent = w_ent.astype(weight_dtype)
        w_num = w_num.astype(weight_dtype)
        w_txt = w_txt.astype(weight_dtype)

    return {"w_ent": w_ent, "w_num": w_num, "w_txt": w_txt,
            "b": b.astype(jnp.float32), "emb_size": E}


def _pick_batch_tile(B, bytes_per_row, vmem_budget_bytes=6 << 20, max_tile=2048):
    """Largest multiple-of-8 divisor of B, capped so double-buffered
    activation+output tiles stay within the VMEM budget (works for all
    generations' default scoped limits without heroics)."""
    cap = min(B, max_tile,
              max(8, (vmem_budget_bytes // (2 * max(bytes_per_row, 1))) // 8 * 8))
    best = B if B <= cap else None
    for tb in range(8, cap + 1, 8):
        if B % tb == 0:
            best = tb
    # TODO(synk): for batch sizes with no multiple-of-8 divisor <= cap, pad the
    # batch in the wrapper instead of falling back to a single whole-batch tile.
    return best if best is not None else B


def gate_multi_forward(x_ent, x_lit_num, x_lit_txt, prepared, *, batch_tile=None):
    """prepared: output of prepare_gate_multi_params (fused, pre-transposed)."""
    B, E = x_ent.shape
    Nn = x_lit_num.shape[1]
    Nt = x_lit_txt.shape[1]
    w_ent, w_num, w_txt, b = (prepared["w_ent"], prepared["w_num"],
                              prepared["w_txt"], prepared["b"])
    assert w_ent.shape == (E, 2 * E)
    assert w_num.shape == (Nn, 2 * E)
    assert w_txt.shape == (Nt, 2 * E)

    itemsize = x_ent.dtype.itemsize
    bytes_per_row = (E + Nn + Nt) * itemsize + E * itemsize  # activations + output
    tb = batch_tile if batch_tile is not None else _pick_batch_tile(B, bytes_per_row)
    assert B % tb == 0, "batch must be divisible by the tile (pad in wrapper)"
    grid = (B // tb,)

    # VMEM budget: double-buffered activation/output tiles + weights, with
    # slack; bounded so it is safe on v7x's 64 MiB physical VMEM as well.
    weight_bytes = sum(int(w.size) * w.dtype.itemsize for w in (w_ent, w_num, w_txt, b))
    act_tile_bytes = tb * bytes_per_row
    vmem_needed = 2 * act_tile_bytes + 2 * weight_bytes + (1 << 20)
    vmem_limit = int(min(48 << 20, max(32 << 20, 2 * vmem_needed)))

    def act_spec(ncols):
        return pl.BlockSpec((tb, ncols), lambda i: (i, 0))

    def weight_spec(shape, pipeline_mode):
        return pl.BlockSpec(shape, lambda i: (0, 0), pipeline_mode=pipeline_mode)

    def build(weight_pipeline_mode):
        return pl.pallas_call(
            gate_multi_kernel,
            out_shape=jax.ShapeDtypeStruct((B, E), x_ent.dtype),
            grid_spec=pltpu.PrefetchScalarGridSpec(
                num_scalar_prefetch=0,
                grid=grid,
                in_specs=[
                    act_spec(E),                                    # x_ent
                    act_spec(Nn),                                   # x_lit_num
                    act_spec(Nt),                                   # x_lit_txt
                    weight_spec((E, 2 * E), weight_pipeline_mode),  # w_ent
                    weight_spec((Nn, 2 * E), weight_pipeline_mode), # w_num
                    weight_spec((Nt, 2 * E), weight_pipeline_mode), # w_txt
                    weight_spec((1, 2 * E), weight_pipeline_mode),  # fused bias
                ],
                out_specs=act_spec(E),
            ),
            compiler_params=pltpu.CompilerParams(
                dimension_semantics=("parallel",),
                vmem_limit_bytes=vmem_limit),
        )(x_ent, x_lit_num, x_lit_txt, w_ent, w_num, w_txt, b)

    try:
        # Weights/bias are grid-invariant -> a single VMEM buffer is enough.
        return build(pl.Buffered(1))
    except Exception:
        # Fallback for environments where pipeline_mode on pallas_call
        # BlockSpecs is unsupported: default double-buffering.
        return build(None)


def reference_forward(x_ent, x_lit_num, x_lit_txt, params):
    x = jnp.concatenate([x_ent, x_lit_num, x_lit_txt], axis=1)
    g_embedded = jnp.tanh(x @ params["g_w"].T + params["g_b"])
    gate = jax.nn.sigmoid(x_ent @ params["gate_ent_w"].T
                          + x_lit_num @ params["gate_num_w"].T
                          + x_lit_txt @ params["gate_txt_w"].T
                          + params["gate_bias"])
    return (1.0 - gate) * x_ent + gate * g_embedded


if __name__ == "__main__":
    # Small, module-consistent shapes.
    B, E, Nn, Nt = 8, 32, 16, 8

    key = jax.random.PRNGKey(0)
    ks = jax.random.split(key, 8)

    x_ent = jax.random.normal(ks[0], (B, E), dtype=jnp.float32)
    x_lit_num = jax.random.normal(ks[1], (B, Nn), dtype=jnp.float32)
    x_lit_txt = jax.random.normal(ks[2], (B, Nt), dtype=jnp.float32)

    # Deterministic parameter init (PyTorch Linear weight layout: (out, in)).
    params = {
        "g_w": 0.1 * jax.random.normal(ks[3], (E, E + Nn + Nt), dtype=jnp.float32),
        "g_b": 0.1 * jax.random.normal(ks[4], (E,), dtype=jnp.float32),
        "gate_ent_w": 0.1 * jax.random.normal(ks[5], (E, E), dtype=jnp.float32),
        "gate_num_w": 0.1 * jax.random.normal(ks[6], (E, Nn), dtype=jnp.float32),
        "gate_txt_w": 0.1 * jax.random.normal(ks[7], (E, Nt), dtype=jnp.float32),
        "gate_bias": jnp.zeros((E,), dtype=jnp.float32),  # nn.Parameter(torch.zeros(emb_size))
    }

    # One-time parameter prep (fuse + transpose), done outside the forward.
    prepared = prepare_gate_multi_params(params)
    prepared = jax.tree_util.tree_map(
        lambda a: jax.block_until_ready(a) if isinstance(a, jax.Array) else a, prepared)

    out = gate_multi_forward(x_ent, x_lit_num, x_lit_txt, prepared)
    out = jax.block_until_ready(out)

    ref = reference_forward(x_ent, x_lit_num, x_lit_txt, params)
    assert out.shape == (B, E)
    assert jnp.allclose(out, ref, atol=1e-5, rtol=1e-5)

    print("KERNEL_OK")
</pallas_src>

<mosaic_0001>
module attributes {stable_mosaic.version = 11 : i64} {
  func.func @gate_multi_kernel(%arg0: i32, %arg1: memref<8x32xf32, #tpu.memory_space<vmem>>, %arg2: memref<8x16xf32, #tpu.memory_space<vmem>>, %arg3: memref<8x8xf32, #tpu.memory_space<vmem>>, %arg4: memref<32x64xf32, #tpu.memory_space<vmem>>, %arg5: memref<16x64xf32, #tpu.memory_space<vmem>>, %arg6: memref<8x64xf32, #tpu.memory_space<vmem>>, %arg7: memref<1x64xf32, #tpu.memory_space<vmem>>, %arg8: memref<8x32xf32, #tpu.memory_space<vmem>>) attributes {dimension_semantics = [#tpu.dimension_semantics<parallel>], iteration_bounds = array<i64: 1>, scalar_prefetch = 0 : i64, scratch_operands = 0 : i64, tpu.core_type = #tpu.core_type<tc>, window_params = [{transform_indices = @transform_0, window_bounds = array<i64: 8, 32>}, {transform_indices = @transform_1, window_bounds = array<i64: 8, 16>}, {transform_indices = @transform_2, window_bounds = array<i64: 8, 8>}, {pipeline_mode = #tpu.pipeline_mode<synchronous>, transform_indices = @transform_3, window_bounds = array<i64: 32, 64>}, {pipeline_mode = #tpu.pipeline_mode<synchronous>, transform_indices = @transform_4, window_bounds = array<i64: 16, 64>}, {pipeline_mode = #tpu.pipeline_mode<synchronous>, transform_indices = @transform_5, window_bounds = array<i64: 8, 64>}, {pipeline_mode = #tpu.pipeline_mode<synchronous>, transform_indices = @transform_6, window_bounds = array<i64: 1, 64>}, {transform_indices = @transform_7, window_bounds = array<i64: 8, 32>}]} {
    %c0 = arith.constant 0 : index
    %c0_0 = arith.constant 0 : index
    %0 = vector.load %arg1[%c0, %c0_0] : memref<8x32xf32, #tpu.memory_space<vmem>>, vector<8x32xf32>
    %c0_1 = arith.constant 0 : index
    %c0_2 = arith.constant 0 : index
    %1 = vector.load %arg2[%c0_1, %c0_2] : memref<8x16xf32, #tpu.memory_space<vmem>>, vector<8x16xf32>
    %c0_3 = arith.constant 0 : index
    %c0_4 = arith.constant 0 : index
    %2 = vector.load %arg3[%c0_3, %c0_4] : memref<8x8xf32, #tpu.memory_space<vmem>>, vector<8x8xf32>
    %c0_5 = arith.constant 0 : index
    %c0_6 = arith.constant 0 : index
    %3 = vector.load %arg7[%c0_5, %c0_6] : memref<1x64xf32, #tpu.memory_space<vmem>>, vector<1x64xf32>
    %c0_7 = arith.constant 0 : index
    %c0_8 = arith.constant 0 : index
    %4 = vector.load %arg4[%c0_7, %c0_8] : memref<32x64xf32, #tpu.memory_space<vmem>>, vector<32x64xf32>
    %cst = arith.constant dense<0.000000e+00> : vector<8x64xf32>
    %5 = tpu.matmul %0, %4, %cst {dimension_numbers = #tpu.dot_dimension_numbers<[1], [0], [0], [1], [0, 0, 1, 1], [], []>} : vector<8x32xf32>, vector<32x64xf32>, vector<8x64xf32> -> vector<8x64xf32>
    %6 = vector.broadcast %3 : vector<1x64xf32> to vector<8x64xf32>
    %7 = arith.addf %6, %5 : vector<8x64xf32>
    %c0_9 = arith.constant 0 : index
    %c0_10 = arith.constant 0 : index
    %8 = vector.load %arg5[%c0_9, %c0_10] : memref<16x64xf32, #tpu.memory_space<vmem>>, vector<16x64xf32>
    %cst_11 = arith.constant dense<0.000000e+00> : vector<8x64xf32>
    %9 = tpu.matmul %1, %8, %cst_11 {dimension_numbers = #tpu.dot_dimension_numbers<[1], [0], [0], [1], [0, 0, 1, 1], [], []>} : vector<8x16xf32>, vector<16x64xf32>, vector<8x64xf32> -> vector<8x64xf32>
    %10 = arith.addf %7, %9 : vector<8x64xf32>
    %c0_12 = arith.constant 0 : index
    %c0_13 = arith.constant 0 : index
    %11 = vector.load %arg6[%c0_12, %c0_13] : memref<8x64xf32, #tpu.memory_space<vmem>>, vector<8x64xf32>
    %cst_14 = arith.constant dense<0.000000e+00> : vector<8x64xf32>
    %12 = tpu.matmul %2, %11, %cst_14 {dimension_numbers = #tpu.dot_dimension_numbers<[1], [0], [0], [1], [0, 0, 1, 1], [], []>} : vector<8x8xf32>, vector<8x64xf32>, vector<8x64xf32> -> vector<8x64xf32>
    %13 = arith.addf %10, %12 : vector<8x64xf32>
    %14 = vector.extract_strided_slice %13 {offsets = [0, 0], sizes = [8, 32], strides = [1, 1]} : vector<8x64xf32> to vector<8x32xf32>
    %15 = math.tanh %14 : vector<8x32xf32>
    %16 = vector.extract_strided_slice %13 {offsets = [0, 32], sizes = [8, 32], strides = [1, 1]} : vector<8x64xf32> to vector<8x32xf32>
    %17 = arith.negf %16 : vector<8x32xf32>
    %18 = math.exp %17 : vector<8x32xf32>
    %cst_15 = arith.constant 1.000000e+00 : f32
    %19 = vector.broadcast %cst_15 : f32 to vector<8x32xf32>
    %20 = arith.addf %19, %18 : vector<8x32xf32>
    %21 = arith.divf %19, %20 : vector<8x32xf32>
    %cst_16 = arith.constant 1.000000e+00 : f32
    %22 = vector.broadcast %cst_16 : f32 to vector<8x32xf32>
    %23 = arith.subf %22, %21 : vector<8x32xf32>
    %24 = arith.mulf %23, %0 : vector<8x32xf32>
    %25 = arith.mulf %21, %15 : vector<8x32xf32>
    %26 = arith.addf %24, %25 : vector<8x32xf32>
    %c0_17 = arith.constant 0 : index
    %c0_18 = arith.constant 0 : index
    %27 = vector.load %arg8[%c0_17, %c0_18] : memref<8x32xf32, #tpu.memory_space<vmem>>, vector<8x32xf32>
    tpu.vector_store %arg8[%c0_17, %c0_18], %26 {strides = array<i32>} : memref<8x32xf32, #tpu.memory_space<vmem>>, vector<8x32xf32>,
    return
  }
  func.func @transform_0(%arg0: i32) -> (i32, i32) {
    %c0_i32 = arith.constant 0 : i32
    %c0_i32_0 = arith.constant 0 : i32
    return %arg0, %c0_i32 : i32, i32
  }
  func.func @transform_1(%arg0: i32) -> (i32, i32) {
    %c0_i32 = arith.constant 0 : i32
    %c0_i32_0 = arith.constant 0 : i32
    return %arg0, %c0_i32 : i32, i32
  }
  func.func @transform_2(%arg0: i32) -> (i32, i32) {
    %c0_i32 = arith.constant 0 : i32
    %c0_i32_0 = arith.constant 0 : i32
    return %arg0, %c0_i32 : i32, i32
  }
  func.func @transform_3(%arg0: i32) -> (i32, i32) {
    %c0_i32 = arith.constant 0 : i32
    %c0_i32_0 = arith.constant 0 : i32
    %c0_i32_1 = arith.constant 0 : i32
    return %c0_i32, %c0_i32_0 : i32, i32
  }
  func.func @transform_4(%arg0: i32) -> (i32, i32) {
    %c0_i32 = arith.constant 0 : i32
    %c0_i32_0 = arith.constant 0 : i32
    %c0_i32_1 = arith.constant 0 : i32
    return %c0_i32, %c0_i32_0 : i32, i32
  }
  func.func @transform_5(%arg0: i32) -> (i32, i32) {
    %c0_i32 = arith.constant 0 : i32
    %c0_i32_0 = arith.constant 0 : i32
    %c0_i32_1 = arith.constant 0 : i32
    return %c0_i32, %c0_i32_0 : i32, i32
  }
  func.func @transform_6(%arg0: i32) -> (i32, i32) {
    %c0_i32 = arith.constant 0 : i32
    %c0_i32_0 = arith.constant 0 : i32
    %c0_i32_1 = arith.constant 0 : i32
    return %c0_i32, %c0_i32_0 : i32, i32
  }
  func.func @transform_7(%arg0: i32) -> (i32, i32) {
    %c0_i32 = arith.constant 0 : i32
    %c0_i32_0 = arith.constant 0 : i32
    return %arg0, %c0_i32 : i32, i32
  }
}

module attributes {stable_mosaic.version = 11 : i64} {
  func.func @gate_multi_kernel(%arg0: i32, %arg1: memref<8x32xf32, #tpu.memory_space<vmem>>, %arg2: memref<8x16xf32, #tpu.memory_space<vmem>>, %arg3: memref<8x8xf32, #tpu.memory_space<vmem>>, %arg4: memref<32x64xf32, #tpu.memory_space<vmem>>, %arg5: memref<16x64xf32, #tpu.memory_space<vmem>>, %arg6: memref<8x64xf32, #tpu.memory_space<vmem>>, %arg7: memref<1x64xf32, #tpu.memory_space<vmem>>, %arg8: memref<8x32xf32, #tpu.memory_space<vmem>>) attributes {dimension_semantics = [#tpu.dimension_semantics<parallel>], iteration_bounds = array<i64: 1>, scalar_prefetch = 0 : i64, scratch_operands = 0 : i64, tpu.core_type = #tpu.core_type<tc>, window_params = [{transform_indices = @transform_0, window_bounds = array<i64: 8, 32>}, {transform_indices = @transform_1, window_bounds = array<i64: 8, 16>}, {transform_indices = @transform_2, window_bounds = array<i64: 8, 8>}, {pipeline_mode = #tpu.pipeline_mode<synchronous>, transform_indices = @transform_3, window_bounds = array<i64: 32, 64>}, {pipeline_mode = #tpu.pipeline_mode<synchronous>, transform_indices = @transform_4, window_bounds = array<i64: 16, 64>}, {pipeline_mode = #tpu.pipeline_mode<synchronous>, transform_indices = @transform_5, window_bounds = array<i64: 8, 64>}, {pipeline_mode = #tpu.pipeline_mode<synchronous>, transform_indices = @transform_6, window_bounds = array<i64: 1, 64>}, {transform_indices = @transform_7, window_bounds = array<i64: 8, 32>}]} {
    %c0 = arith.constant 0 : index
    %c0_0 = arith.constant 0 : index
    %0 = vector.load %arg1[%c0, %c0_0] : memref<8x32xf32, #tpu.memory_space<vmem>>, vector<8x32xf32>
    %c0_1 = arith.constant 0 : index
    %c0_2 = arith.constant 0 : index
    %1 = vector.load %arg2[%c0_1, %c0_2] : memref<8x16xf32, #tpu.memory_space<vmem>>, vector<8x16xf32>
    %c0_3 = arith.constant 0 : index
    %c0_4 = arith.constant 0 : index
    %2 = vector.load %arg3[%c0_3, %c0_4] : memref<8x8xf32, #tpu.memory_space<vmem>>, vector<8x8xf32>
    %c0_5 = arith.constant 0 : index
    %c0_6 = arith.constant 0 : index
    %3 = vector.load %arg7[%c0_5, %c0_6] : memref<1x64xf32, #tpu.memory_space<vmem>>, vector<1x64xf32>
    %c0_7 = arith.constant 0 : index
    %c0_8 = arith.constant 0 : index
    %4 = vector.load %arg4[%c0_7, %c0_8] : memref<32x64xf32, #tpu.memory_space<vmem>>, vector<32x64xf32>
    %cst = arith.constant dense<0.000000e+00> : vector<8x64xf32>
    %5 = tpu.matmul %0, %4, %cst {dimension_numbers = #tpu.dot_dimension_numbers<[1], [0], [0], [1], [0, 0, 1, 1], [], []>} : vector<8x32xf32>, vector<32x64xf32>, vector<8x64xf32> -> vector<8x64xf32>
    %6 = vector.broadcast %3 : vector<1x64xf32> to vector<8x64xf32>
    %7 = arith.addf %6, %5 : vector<8x64xf32>
    %c0_9 = arith.constant 0 : index
    %c0_10 = arith.constant 0 : index
    %8 = vector.load %arg5[%c0_9, %c0_10] : memref<16x64xf32, #tpu.memory_space<vmem>>, vector<16x64xf32>
    %cst_11 = arith.constant dense<0.000000e+00> : vector<8x64xf32>
    %9 = tpu.matmul %1, %8, %cst_11 {dimension_numbers = #tpu.dot_dimension_numbers<[1], [0], [0], [1], [0, 0, 1, 1], [], []>} : vector<8x16xf32>, vector<16x64xf32>, vector<8x64xf32> -> vector<8x64xf32>
    %10 = arith.addf %7, %9 : vector<8x64xf32>
    %c0_12 = arith.constant 0 : index
    %c0_13 = arith.constant 0 : index
    %11 = vector.load %arg6[%c0_12, %c0_13] : memref<8x64xf32, #tpu.memory_space<vmem>>, vector<8x64xf32>
    %cst_14 = arith.constant dense<0.000000e+00> : vector<8x64xf32>
    %12 = tpu.matmul %2, %11, %cst_14 {dimension_numbers = #tpu.dot_dimension_numbers<[1], [0], [0], [1], [0, 0, 1, 1], [], []>} : vector<8x8xf32>, vector<8x64xf32>, vector<8x64xf32> -> vector<8x64xf32>
    %13 = arith.addf %10, %12 : vector<8x64xf32>
    %14 = vector.extract_strided_slice %13 {offsets = [0, 0], sizes = [8, 32], strides = [1, 1]} : vector<8x64xf32> to vector<8x32xf32>
    %15 = math.tanh %14 : vector<8x32xf32>
    %16 = vector.extract_strided_slice %13 {offsets = [0, 32], sizes = [8, 32], strides = [1, 1]} : vector<8x64xf32> to vector<8x32xf32>
    %17 = arith.negf %16 : vector<8x32xf32>
    %18 = math.exp %17 : vector<8x32xf32>
    %cst_15 = arith.constant 1.000000e+00 : f32
    %19 = vector.broadcast %cst_15 : f32 to vector<8x32xf32>
    %20 = arith.addf %19, %18 : vector<8x32xf32>
    %21 = arith.divf %19, %20 : vector<8x32xf32>
    %cst_16 = arith.constant 1.000000e+00 : f32
    %22 = vector.broadcast %cst_16 : f32 to vector<8x32xf32>
    %23 = arith.subf %22, %21 : vector<8x32xf32>
    %24 = arith.mulf %23, %0 : vector<8x32xf32>
    %25 = arith.mulf %21, %15 : vector<8x32xf32>
    %26 = arith.addf %24, %25 : vector<8x32xf32>
    %c0_17 = arith.constant 0 : index
    %c0_18 = arith.constant 0 : index
    %27 = vector.load %arg8[%c0_17, %c0_18] : memref<8x32xf32, #tpu.memory_space<vmem>>, vector<8x32xf32>
    tpu.vector_store %arg8[%c0_17, %c0_18], %26 {strides = array<i32>} : memref<8x32xf32, #tpu.memory_space<vmem>>, vector<8x32xf32>,
    return
  }
  func.func @transform_0(%arg0: i32) -> (i32, i32) {
    %c0_i32 = arith.constant 0 : i32
    %c0_i32_0 = arith.constant 0 : i32
    return %arg0, %c0_i32 : i32, i32
  }
  func.func @transform_1(%arg0: i32) -> (i32, i32) {
    %c0_i32 = arith.constant 0 : i32
    %c0_i32_0 = arith.constant 0 : i32
    return %arg0, %c0_i32 : i32, i32
  }
  func.func @transform_2(%arg0: i32) -> (i32, i32) {
    %c0_i32 = arith.constant 0 : i32
    %c0_i32_0 = arith.constant 0 : i32
    return %arg0, %c0_i32 : i32, i32
  }
  func.func @transform_3(%arg0: i32) -> (i32, i32) {
    %c0_i32 = arith.constant 0 : i32
    %c0_i32_0 = arith.constant 0 : i32
    %c0_i32_1 = arith.constant 0 : i32
    return %c0_i32, %c0_i32_0 : i32, i32
  }
  func.func @transform_4(%arg0: i32) -> (i32, i32) {
    %c0_i32 = arith.constant 0 : i32
    %c0_i32_0 = arith.constant 0 : i32
    %c0_i32_1 = arith.constant 0 : i32
    return %c0_i32, %c0_i32_0 : i32, i32
  }
  func.func @transform_5(%arg0: i32) -> (i32, i32) {
    %c0_i32 = arith.constant 0 : i32
    %c0_i32_0 = arith.constant 0 : i32
    %c0_i32_1 = arith.constant 0 : i32
    return %c0_i32, %c0_i32_0 : i32, i32
  }
  func.func @transform_6(%arg0: i32) -> (i32, i32) {
    %c0_i32 = arith.constant 0 : i32
    %c0_i32_0 = arith.constant 0 : i32
    %c0_i32_1 = arith.constant 0 : i32
    return %c0_i32, %c0_i32_0 : i32, i32
  }
  func.func @transform_7(%arg0: i32) -> (i32, i32) {
    %c0_i32 = arith.constant 0 : i32
    %c0_i32_0 = arith.constant 0 : i32
    return %arg0, %c0_i32 : i32, i32
  }
}

</mosaic_0001>

<bundles_post_ra>
// kernel: tpu_custom_call.1
= control target key start
LH: loop header
LB: loop body
LE: loop exit
PB: predicated region body
PF: predicated region fallthrough
CT: control target
= control target key end

     0   :  { %12 = vsyncpa [#allocation3], 0  ;;  %s535_s0 = inlined_call_operand.hbm [shape: f32[8,32], index: 0, kind: input, shape index: {}]   ;;  %s536_s1 = inlined_call_operand.hbm [shape: f32[8,16], index: 1, kind: input, shape index: {}]   ;;  %s537_s2 = inlined_call_operand.hbm [shape: f32[8,8], index: 2, kind: input, shape index: {}]   ;;  %s538_s3 = inlined_call_operand.hbm [shape: f32[32,64], index: 3, kind: input, shape index: {}]   ;;  %s539_s4 = inlined_call_operand.hbm [shape: f32[16,64], index: 4, kind: input, shape index: {}]   ;;  %s540_s5 = inlined_call_operand.hbm [shape: f32[8,64], index: 5, kind: input, shape index: {}]   ;;  %s541_s6 = inlined_call_operand.vmem [shape: f32[1,64], index: 6, kind: input, shape index: {}]   ;;  %s542_s7 = inlined_call_operand.hbm [shape: f32[8,32], index: 7, kind: output, shape index: {}]  }
   0x1   :  { %13 = vsyncpa [#allocation6], 0 }
   0x2   :  { %14 = vsyncpa [#allocation9], 0 }
   0x3   :  { %15 = vsyncpa [#allocation12], 0  ;;  %s33_s26 = sshll.u32 %s536_s1, 4  ;;  %s34_s26 = int_to_ptr.hbm [resolvable:$true] %s33_s26 }
   0x4   :  { %16 = vsyncpa [#allocation4], 0  ;;  %s458_s27 = smov [#allocation5]   ;;  %s54_s8 = sshll.u32 %s538_s3, 4  ;;  %s55_s8 = int_to_ptr.hbm [resolvable:$true] %s54_s8 }
   0x5   :  { %s35_s28 = sshll.u32 %s458_s27, 4  ;;  %s459_s9 = smov [#allocation8]   ;;  %s36_s28 = int_to_ptr.vmem [resolvable:$true] %s35_s28 }
   0x6   :  { %38 = dma.hbm_to_vmem [thread:$0]  %s34_s26, 128, %s36_s28, [#allocation6]  }
   0x7   :  { %s56_s10 = sshll.u32 %s459_s9, 4  ;;  %s460_s11 = smov 128   ;;  %s57_s10 = int_to_ptr.vmem [resolvable:$true] %s56_s10 }
   0x8   :  { %s461_s12 = smov 8   ;;  %s22_s1 = sshll.u32 %s535_s0, 4  ;;  %s23_s1 = int_to_ptr.hbm [resolvable:$true] %s22_s1 }
   0x9   :  { %62 = dma.hbm_to_vmem [thread:$0]  %s55_s8, 512, %s57_s10, [#allocation9], %s460_s11, %s460_s11, %s461_s12  }
   0xa   :  { %s462_s15 = smov [#allocation2]   ;;  %s44_s3 = sshll.u32 %s537_s2, 4  ;;  %s45_s3 = int_to_ptr.hbm [resolvable:$true] %s44_s3 }
   0xb   :  { %s24_s16 = sshll.u32 %s462_s15, 4  ;;  %s463_s19 = smov [#allocation7]   ;;  %s25_s16 = int_to_ptr.vmem [resolvable:$true] %s24_s16 }
   0xc   :  { %27 = dma.hbm_to_vmem [thread:$0]  %s23_s1, 128, %s25_s16, [#allocation3]  }
   0xd   :  { %s46_s20 = sshll.u32 %s463_s19, 4  ;;  %s67_s23 = sshll.u32 %s539_s4, 4  ;;  %s47_s20 = int_to_ptr.vmem [resolvable:$true] %s46_s20  ;;  %s68_s23 = int_to_ptr.hbm [resolvable:$true] %s67_s23 }
   0xe   :  { %49 = dma.hbm_to_vmem [thread:$0]  %s45_s3, 128, %s47_s20, [#allocation6]  }
   0xf   :  { %s81_s25 = sshll.u32 %s540_s5, 4  ;;  %s464_s26 = smov [#allocation10]   ;;  %s82_s25 = int_to_ptr.hbm [resolvable:$true] %s81_s25 }
  0x10   :  { %s69_s27 = sshll.u32 %s464_s26, 4  ;;  %s465_s2 = smov [#allocation11]   ;;  %s70_s27 = int_to_ptr.vmem [resolvable:$true] %s69_s27 }
  0x11   :  { %75 = dma.hbm_to_vmem [thread:$0]  %s68_s23, 256, %s70_s27, [#allocation9], %s460_s11, %s460_s11, %s461_s12  }
  0x12   :  { %s83_s28 = sshll.u32 %s465_s2, 4  ;;  %s84_s28 = int_to_ptr.vmem [resolvable:$true] %s83_s28 }
  0x13   :  { %86 = dma.hbm_to_vmem [thread:$0]  %s82_s25, 128, %s84_s28, [#allocation12]  }
  0x14   :  { %448 = dma.done.wait [#allocation3], 128  }
  0x15   :  { %449 = vsyncadd [#allocation3], 4294967168 }
  0x16   :  { %450 = dma.done.wait [#allocation6], 256  }
  0x17   :  { %451 = vsyncadd [#allocation6], 4294967040 }
  0x18   :  { %452 = dma.done.wait [#allocation9], 768  }
  0x19   :  { %453 = vsyncadd [#allocation9], 4294966528 }
  0x1a   :  { %454 = dma.done.wait [#allocation12], 128  }
  0x1b   :  { %455 = vsyncadd [#allocation12], 4294967168  ;;  %v120_v0 = vld [vmem:[#allocation8 + $0x18] sm:$0xff]  ;;  %v119_v1 = vld [vmem:[#allocation8 + $0x10] sm:$0xff]  ;;  %vm177_vm0 = vcmask 64512   ;;  %vm151_vm1 = vcmask 130048  }
  0x1c   :  { %137 = vmatpush.msra.mxu0 %v120_v0  ;;  %v176_v2 = vld [vmem:[#allocation11] sm:$0xff]  ;;  %v115_v3 = vld [vmem:[#allocation7] sm:$0xff]  ;;  %v118_v4 = vld [vmem:[#allocation8 + $0x8] sm:$0xff]  ;;  %s466_s4 = smov 32   ;;  %vm121_vm2 = vcmask 261120   ;;  %s468_s30 = smov [#allocation13]  }
  0x1d   :  { %196 = vmatpush.msra.mxu2 %v176_v2  ;;  %v150_v5 = vld [vmem:[#allocation10 + $0x8] sm:$0xff]  ;;  %v149_v7 = vld [vmem:[#allocation10] sm:$0xff]  ;;  %v114_v9 = vld [vmem:[#allocation5] sm:$0xff]  ;;  %s243_s8 = sshll.u32 %s468_s30, 4  ;;  %s245_s11 = sshll.u32 %s542_s7, 4  ;;  %s244_s8 = int_to_ptr.vmem [resolvable:$true] %s243_s8  ;;  %s246_s11 = int_to_ptr.hbm [resolvable:$true] %s245_s11 }
  0x1e   :  { %138 = vmatpush.msra.mxu0 %v119_v1  ;;  %260 = vmatmul.msk.f32.vlgmr.msra.gmra.mxu2 %vm177_vm0, %v115_v3  ;;  %v113_v6 = vld [vmem:[#allocation2] sm:$0xff]  ;;  %v117_v8 = vld [vmem:[#allocation8] sm:$0xff] }
  0x1f   :  { %169 = vmatpush.msra.mxu1 %v150_v5  ;;  %223 = vrot.lane.b32.xlu0 %v113_v6, %s466_s4  ;;  %v273_v10 = vld [vmem:[%s541_s6] ss:$0 sm:$0xff]  ;;  %s467_s6 = smov 96  }
  0x20   :  { %139 = vmatpush.msra.mxu0 %v118_v4 }
  0x21   :  { %170 = vmatpush.msra.mxu1 %v149_v7 }
  0x22   :  { %140 = vmatpush.msra.mxu0 %v117_v8  ;;  %259 = vmatmul.msk.f32.vlgmr.msra.gmra.mxu1 %vm151_vm1, %v114_v9 }
  0x23   :  { %258 = vmatmul.msk.f32.vlgmr.msra.gmra.mxu0 %vm121_vm2, %v113_v6 }
  0x91   :  { %v224_v29 = vpop.permute.xlu0 %223 }
  0x9f   :  { %v172_v12 = vpop.f32.mrf.mxu1 }
  0xa0   :  { %v142_v11 = vpop.f32.mrf.mxu0 }
  0xa1   :  { %v148_v13 = vadd.f32 %v273_v10, %v142_v11  ;;  %v198_v14 = vpop.f32.mrf.mxu2 }
  0xa3   :  { %v175_v15 = vadd.f32 %v172_v12, %v148_v13 }
  0xa5   :  { %v201_v16 = vadd.f32 %v198_v14, %v175_v15 }
  0xa7   :  { %274 = vtanh.f32 %v201_v16  ;;  %v261_v18 = vmul.f32 -1.442695, %v201_v16 }
  0xa9   :  { %276 = vpow2.f32 %v261_v18 }
  0xad   :  { %v275_v17 = vpop.eup %274 }
  0xae   :  { %228 = vrot.lane.b32.xlu0 %v275_v17, %s466_s4 }
  0xaf   :  { %v277_v19 = vpop.eup %276 }
  0xb0   :  { %v206_v20 = vadd.f32 1.0, %v277_v19 }
  0xb2   :  { %278 = vrcp.f32 %v206_v20  ;;  %v218_v26 = vand.u32 2147483648, %v206_v20  ;;  %vm212_vm4 = vweird.f32 %v206_v20  ;;  %v216_v27 = vand.u32 2147483647, %v206_v20 }
  0xb4   :  { %v219_v30 = vor.u32 1.1754944e-38, %v218_v26  ;;  %vm217_vm6 = vcmp.eq.f32.partialorder %v216_v27, 8.507059e+37 }
  0xb8   :  { %v279_v21 = vpop.eup %278 }
  0xb9   :  { %v208_v22 = vmul.f32 %v279_v21, %v206_v20  ;;  %vm213_vm3 = vweird.f32 %v279_v21 }
  0xba   :  { %vm214_vm5 = vmor %vm212_vm4, %vm213_vm3 }
  0xbb   :  { %v209_v23 = vsub.f32 1.0, %v208_v22 }
  0xbd   :  { %v210_v24 = vmul.f32 %v279_v21, %v209_v23 }
  0xbf   :  { %v211_v25 = vadd.f32 %v279_v21, %v210_v24 }
  0xc1   :  { %v215_v28 = vsel %vm214_vm5, %v279_v21, %v211_v25 }
  0xc2   :  { %v220_v31 = vsel %vm217_vm6, %v219_v30, %v215_v28 }
  0xc3   :  { %v222_v32 = vsub.f32 1.0, %v220_v31 }
  0xc5   :  { %v226_v34 = vmul.f32 %v224_v29, %v222_v32 }
 0x120   :  { %v229_v33 = vpop.permute.xlu0 %228 }
 0x121   :  { %v231_v35 = vmul.f32 %v229_v33, %v220_v31 }
 0x123   :  { %v232_v36 = vadd.f32 %v231_v35, %v226_v34 }
 0x125   :  { %234 = vrot.lane.b32.xlu1 %v232_v36, %s467_s6 }
 0x197   :  { %v235_v37 = vpop.permute.xlu1 %234 }
 0x198   :  { %237 = vst.msk [vmem:[#allocation13] sm:$0xff] %vm121_vm2, %v235_v37 }
 0x199   :  { %248 = dma.vmem_to_hbm [thread:$0]  %s244_s8, 128, %s246_s11, [#allocation4]  }
 0x19a   :  { %456 = dma.done.wait [#allocation4], 128  }
 0x19b   :  { %457 = vsyncadd [#allocation4], 4294967168 }
 0x19c   :  { %253 = vsyncpa [#allocation3], 1 }
 0x19d   :  { %254 = vsyncpa [#allocation6], 1 }
 0x19e   :  { %255 = vsyncpa [#allocation9], 1 }
 0x19f   :  { %256 = vsyncpa [#allocation12], 1 }
 0x1a0   :  { %257 = vsyncpa [#allocation4], 1 }

// kernel: tpu_custom_call.1
= control target key start
LH: loop header
LB: loop body
LE: loop exit
PB: predicated region body
PF: predicated region fallthrough
CT: control target
= control target key end

     0   :  { %12 = vsyncpa [#allocation3], 0  ;;  %s535_s0 = inlined_call_operand.hbm [shape: f32[8,32], index: 0, kind: input, shape index: {}]   ;;  %s536_s1 = inlined_call_operand.hbm [shape: f32[8,16], index: 1, kind: input, shape index: {}]   ;;  %s537_s2 = inlined_call_operand.hbm [shape: f32[8,8], index: 2, kind: input, shape index: {}]   ;;  %s538_s3 = inlined_call_operand.hbm [shape: f32[32,64], index: 3, kind: input, shape index: {}]   ;;  %s539_s4 = inlined_call_operand.hbm [shape: f32[16,64], index: 4, kind: input, shape index: {}]   ;;  %s540_s5 = inlined_call_operand.hbm [shape: f32[8,64], index: 5, kind: input, shape index: {}]   ;;  %s541_s6 = inlined_call_operand.vmem [shape: f32[1,64], index: 6, kind: input, shape index: {}]   ;;  %s542_s7 = inlined_call_operand.hbm [shape: f32[8,32], index: 7, kind: output, shape index: {}]  }
   0x1   :  { %13 = vsyncpa [#allocation6], 0 }
   0x2   :  { %14 = vsyncpa [#allocation9], 0 }
   0x3   :  { %15 = vsyncpa [#allocation12], 0  ;;  %s33_s26 = sshll.u32 %s536_s1, 4  ;;  %s34_s26 = int_to_ptr.hbm [resolvable:$true] %s33_s26 }
   0x4   :  { %16 = vsyncpa [#allocation4], 0  ;;  %s458_s27 = smov [#allocation5]   ;;  %s54_s8 = sshll.u32 %s538_s3, 4  ;;  %s55_s8 = int_to_ptr.hbm [resolvable:$true] %s54_s8 }
   0x5   :  { %s35_s28 = sshll.u32 %s458_s27, 4  ;;  %s459_s9 = smov [#allocation8]   ;;  %s36_s28 = int_to_ptr.vmem [resolvable:$true] %s35_s28 }
   0x6   :  { %38 = dma.hbm_to_vmem [thread:$0]  %s34_s26, 128, %s36_s28, [#allocation6]  }
   0x7   :  { %s56_s10 = sshll.u32 %s459_s9, 4  ;;  %s460_s11 = smov 128   ;;  %s57_s10 = int_to_ptr.vmem [resolvable:$true] %s56_s10 }
   0x8   :  { %s461_s12 = smov 8   ;;  %s22_s1 = sshll.u32 %s535_s0, 4  ;;  %s23_s1 = int_to_ptr.hbm [resolvable:$true] %s22_s1 }
   0x9   :  { %62 = dma.hbm_to_vmem [thread:$0]  %s55_s8, 512, %s57_s10, [#allocation9], %s460_s11, %s460_s11, %s461_s12  }
   0xa   :  { %s462_s15 = smov [#allocation2]   ;;  %s44_s3 = sshll.u32 %s537_s2, 4  ;;  %s45_s3 = int_to_ptr.hbm [resolvable:$true] %s44_s3 }
   0xb   :  { %s24_s16 = sshll.u32 %s462_s15, 4  ;;  %s463_s19 = smov [#allocation7]   ;;  %s25_s16 = int_to_ptr.vmem [resolvable:$true] %s24_s16 }
   0xc   :  { %27 = dma.hbm_to_vmem [thread:$0]  %s23_s1, 128, %s25_s16, [#allocation3]  }
   0xd   :  { %s46_s20 = sshll.u32 %s463_s19, 4  ;;  %s67_s23 = sshll.u32 %s539_s4, 4  ;;  %s47_s20 = int_to_ptr.vmem [resolvable:$true] %s46_s20  ;;  %s68_s23 = int_to_ptr.hbm [resolvable:$true] %s67_s23 }
   0xe   :  { %49 = dma.hbm_to_vmem [thread:$0]  %s45_s3, 128, %s47_s20, [#allocation6]  }
   0xf   :  { %s81_s25 = sshll.u32 %s540_s5, 4  ;;  %s464_s26 = smov [#allocation10]   ;;  %s82_s25 = int_to_ptr.hbm [resolvable:$true] %s81_s25 }
  0x10   :  { %s69_s27 = sshll.u32 %s464_s26, 4  ;;  %s465_s2 = smov [#allocation11]   ;;  %s70_s27 = int_to_ptr.vmem [resolvable:$true] %s69_s27 }
  0x11   :  { %75 = dma.hbm_to_vmem [thread:$0]  %s68_s23, 256, %s70_s27, [#allocation9], %s460_s11, %s460_s11, %s461_s12  }
  0x12   :  { %s83_s28 = sshll.u32 %s465_s2, 4  ;;  %s84_s28 = int_to_ptr.vmem [resolvable:$true] %s83_s28 }
  0x13   :  { %86 = dma.hbm_to_vmem [thread:$0]  %s82_s25, 128, %s84_s28, [#allocation12]  }
  0x14   :  { %448 = dma.done.wait [#allocation3], 128  }
  0x15   :  { %449 = vsyncadd [#allocation3], 4294967168 }
  0x16   :  { %450 = dma.done.wait [#allocation6], 256  }
  0x17   :  { %451 = vsyncadd [#allocation6], 4294967040 }
  0x18   :  { %452 = dma.done.wait [#allocation9], 768  }
  0x19   :  { %453 = vsyncadd [#allocation9], 4294966528 }
  0x1a   :  { %454 = dma.done.wait [#allocation12], 128  }
  0x1b   :  { %455 = vsyncadd [#allocation12], 4294967168  ;;  %v120_v0 = vld [vmem:[#allocation8 + $0x18] sm:$0xff]  ;;  %v119_v1 = vld [vmem:[#allocation8 + $0x10] sm:$0xff]  ;;  %vm177_vm0 = vcmask 64512   ;;  %vm151_vm1 = vcmask 130048  }
  0x1c   :  { %137 = vmatpush.msra.mxu0 %v120_v0  ;;  %v176_v2 = vld [vmem:[#allocation11] sm:$0xff]  ;;  %v115_v3 = vld [vmem:[#allocation7] sm:$0xff]  ;;  %v118_v4 = vld [vmem:[#allocation8 + $0x8] sm:$0xff]  ;;  %s466_s4 = smov 32   ;;  %vm121_vm2 = vcmask 261120   ;;  %s468_s30 = smov [#allocation13]  }
  0x1d   :  { %196 = vmatpush.msra.mxu2 %v176_v2  ;;  %v150_v5 = vld [vmem:[#allocation10 + $0x8] sm:$0xff]  ;;  %v149_v7 = vld [vmem:[#allocation10] sm:$0xff]  ;;  %v114_v9 = vld [vmem:[#allocation5] sm:$0xff]  ;;  %s243_s8 = sshll.u32 %s468_s30, 4  ;;  %s245_s11 = sshll.u32 %s542_s7, 4  ;;  %s244_s8 = int_to_ptr.vmem [resolvable:$true] %s243_s8  ;;  %s246_s11 = int_to_ptr.hbm [resolvable:$true] %s245_s11 }
  0x1e   :  { %138 = vmatpush.msra.mxu0 %v119_v1  ;;  %260 = vmatmul.msk.f32.vlgmr.msra.gmra.mxu2 %vm177_vm0, %v115_v3  ;;  %v113_v6 = vld [vmem:[#allocation2] sm:$0xff]  ;;  %v117_v8 = vld [vmem:[#allocation8] sm:$0xff] }
  0x1f   :  { %169 = vmatpush.msra.mxu1 %v150_v5  ;;  %223 = vrot.lane.b32.xlu0 %v113_v6, %s466_s4  ;;  %v273_v10 = vld [vmem:[%s541_s6] ss:$0 sm:$0xff]  ;;  %s467_s6 = smov 96  }
  0x20   :  { %139 = vmatpush.msra.mxu0 %v118_v4 }
  0x21   :  { %170 = vmatpush.msra.mxu1 %v149_v7 }
  0x22   :  { %140 = vmatpush.msra.mxu0 %v117_v8  ;;  %259 = vmatmul.msk.f32.vlgmr.msra.gmra.mxu1 %vm151_vm1, %v114_v9 }
  0x23   :  { %258 = vmatmul.msk.f32.vlgmr.msra.gmra.mxu0 %vm121_vm2, %v113_v6 }
  0x91   :  { %v224_v29 = vpop.permute.xlu0 %223 }
  0x9f   :  { %v172_v12 = vpop.f32.mrf.mxu1 }
  0xa0   :  { %v142_v11 = vpop.f32.mrf.mxu0 }
  0xa1   :  { %v148_v13 = vadd.f32 %v273_v10, %v142_v11  ;;  %v198_v14 = vpop.f32.mrf.mxu2 }
  0xa3   :  { %v175_v15 = vadd.f32 %v172_v12, %v148_v13 }
  0xa5   :  { %v201_v16 = vadd.f32 %v198_v14, %v175_v15 }
  0xa7   :  { %274 = vtanh.f32 %v201_v16  ;;  %v261_v18 = vmul.f32 -1.442695, %v201_v16 }
  0xa9   :  { %276 = vpow2.f32 %v261_v18 }
  0xad   :  { %v275_v17 = vpop.eup %274 }
  0xae   :  { %228 = vrot.lane.b32.xlu0 %v275_v17, %s466_s4 }
  0xaf   :  { %v277_v19 = vpop.eup %276 }
  0xb0   :  { %v206_v20 = vadd.f32 1.0, %v277_v19 }
  0xb2   :  { %278 = vrcp.f32 %v206_v20  ;;  %v218_v26 = vand.u32 2147483648, %v206_v20  ;;  %vm212_vm4 = vweird.f32 %v206_v20  ;;  %v216_v27 = vand.u32 2147483647, %v206_v20 }
  0xb4   :  { %v219_v30 = vor.u32 1.1754944e-38, %v218_v26  ;;  %vm217_vm6 = vcmp.eq.f32.partialorder %v216_v27, 8.507059e+37 }
  0xb8   :  { %v279_v21 = vpop.eup %278 }
  0xb9   :  { %v208_v22 = vmul.f32 %v279_v21, %v206_v20  ;;  %vm213_vm3 = vweird.f32 %v279_v21 }
  0xba   :  { %vm214_vm5 = vmor %vm212_vm4, %vm213_vm3 }
  0xbb   :  { %v209_v23 = vsub.f32 1.0, %v208_v22 }
  0xbd   :  { %v210_v24 = vmul.f32 %v279_v21, %v209_v23 }
  0xbf   :  { %v211_v25 = vadd.f32 %v279_v21, %v210_v24 }
  0xc1   :  { %v215_v28 = vsel %vm214_vm5, %v279_v21, %v211_v25 }
  0xc2   :  { %v220_v31 = vsel %vm217_vm6, %v219_v30, %v215_v28 }
  0xc3   :  { %v222_v32 = vsub.f32 1.0, %v220_v31 }
  0xc5   :  { %v226_v34 = vmul.f32 %v224_v29, %v222_v32 }
 0x120   :  { %v229_v33 = vpop.permute.xlu0 %228 }
 0x121   :  { %v231_v35 = vmul.f32 %v229_v33, %v220_v31 }
 0x123   :  { %v232_v36 = vadd.f32 %v231_v35, %v226_v34 }
 0x125   :  { %234 = vrot.lane.b32.xlu1 %v232_v36, %s467_s6 }
 0x197   :  { %v235_v37 = vpop.permute.xlu1 %234 }
 0x198   :  { %237 = vst.msk [vmem:[#allocation13] sm:$0xff] %vm121_vm2, %v235_v37 }
 0x199   :  { %248 = dma.vmem_to_hbm [thread:$0]  %s244_s8, 128, %s246_s11, [#allocation4]  }
 0x19a   :  { %456 = dma.done.wait [#allocation4], 128  }
 0x19b   :  { %457 = vsyncadd [#allocation4], 4294967168 }
 0x19c   :  { %253 = vsyncpa [#allocation3], 1 }
 0x19d   :  { %254 = vsyncpa [#allocation6], 1 }
 0x19e   :  { %255 = vsyncpa [#allocation9], 1 }
 0x19f   :  { %256 = vsyncpa [#allocation12], 1 }
 0x1a0   :  { %257 = vsyncpa [#allocation4], 1 }

</bundles_post_ra>
